<compile_context>
chip_gen: v6e
topology: v6e:2x2x1
jax: 0.10.0
libtpu: 0.0.40
codegen_flags: <defaults>
</compile_context>

<pallas_src>
import functools
import math

import jax
import jax.numpy as jnp
from jax.experimental import pallas as pl
from jax.experimental.pallas import tpu as pltpu


def _attn_kernel(q_ref, k_ref, v_ref, o_ref, *p_refs, scale, mxu_dtype):
    # q_ref: (G, Tq, D), k_ref/v_ref: (G, S, D), o_ref: (G, Tq, D),
    # p_refs: () or ((G, Tq, S) ref,)
    q = q_ref[...] * scale          # fold 1/sqrt(D) into the small operand
    k = k_ref[...]
    v = v_ref[...]
    if mxu_dtype is not None:       # opt-in low-precision MXU operands
        q = q.astype(mxu_dtype)
        k = k.astype(mxu_dtype)
        v = v.astype(mxu_dtype)

    # scores[g, i, j] = sum_d q[g, i, d] * k[g, j, d]  -- contraction on the
    # last dims of both operands: feeds the MXU directly, no K transpose.
    scores = jnp.einsum(
        "gqd,gkd->gqk", q, k, preferred_element_type=jnp.float32
    )  # (G, Tq, S), f32

    # Numerically stable softmax along the key axis (full K axis in-block).
    m = jnp.max(scores, axis=-1, keepdims=True)
    e = jnp.exp(scores - m)
    denom = jnp.sum(e, axis=-1, keepdims=True)
    p = e * pl.reciprocal(denom, approx=False)  # exact, matches reference

    # Single cast of the largest tensor, reused for store + PV matmul.
    p_lo = p.astype(v.dtype)
    if p_refs:
        p_ref = p_refs[0]
        p_ref[...] = p_lo if p_ref.dtype == p_lo.dtype else p.astype(p_ref.dtype)

    ctx = jnp.einsum(
        "gqk,gkd->gqd", p_lo, v, preferred_element_type=jnp.float32
    )  # (G, Tq, D)
    o_ref[...] = ctx.astype(o_ref.dtype)


def _vmem_capacity_bytes():
    """Physical VMEM of the local TPU generation (fallback: v7x-safe 64 MiB)."""
    try:
        return int(pltpu.get_tpu_info().vmem_capacity_bytes)
    except Exception:
        return 64 * 1024 * 1024


def _pick_tiles(BH, S, D, in_itemsize, p_itemsize, with_p, step_budget, multi_tc):
    """Choose (G = heads per grid step, Tq = query-axis tile)."""
    # Tile the query axis for long sequences so the (Tq, S) score tile stays
    # bounded; softmax axis (K) stays whole per step.
    Tq = S
    for cand in (1024, 512, 256, 128):
        if S > cand and S % cand == 0:
            Tq = cand
            break

    def step_bytes(g):
        # double-buffered I/O blocks + in-kernel f32 intermediates
        io = 2 * in_itemsize * (g * Tq * D + 2 * g * S * D + g * Tq * D)
        if with_p:
            io += 2 * p_itemsize * g * Tq * S
        scratch = 3 * 4 * g * Tq * S + 4 * g * Tq * D
        return io + scratch

    g = 1
    for cand in range(BH, 0, -1):
        if BH % cand == 0 and step_bytes(cand) <= step_budget:
            g = cand
            break

    # Only on multi-TensorCore chips (v7x): make sure the BH grid axis has at
    # least 2 steps so both cores get work (the inner axis is "arbitrary" and
    # is never core-sharded, avoiding duplicate K/V DMA).  On single-TC
    # v5e/v6e splitting is a pure loss, so G = BH is kept when it fits.
    if multi_tc and BH >= 2 and (BH // g) < 2:
        g = next(BH // k for k in range(2, BH + 1) if BH % k == 0)
    return g, Tq


def attention(query, key, value, *, return_p=True, p_dtype=None, mxu_dtype=None):
    """Pallas implementation of Attention.forward. Inputs are [B, H, S, D].

    return_p=False skips the O(BH*S^2) p_attn writeback entirely (fast path).
    p_dtype (e.g. jnp.bfloat16) halves the p_attn HBM stream when set.
    mxu_dtype (e.g. jnp.bfloat16) casts matmul operands for the MXU (opt-in,
    loosens precision vs. the f32 reference).
    """
    B, H, S, D = query.shape
    assert key.shape == (B, H, S, D) and value.shape == (B, H, S, D)
    BH = B * H

    # Free reshape over leading dims: [B, H, S, D] -> [BH, S, D].
    qf = query.reshape(BH, S, D)
    kf = key.reshape(BH, S, D)
    vf = value.reshape(BH, S, D)

    in_itemsize = query.dtype.itemsize
    p_out_dtype = jnp.dtype(p_dtype) if p_dtype is not None else query.dtype
    p_itemsize = p_out_dtype.itemsize

    # Generation-aware VMEM budgeting.
    vmem_cap = _vmem_capacity_bytes()
    if vmem_cap >= 96 * 1024 * 1024:
        # v5e / v6e: 128 MiB physical VMEM, single TensorCore per chip.
        step_budget = 56 * 1024 * 1024
        vmem_limit = min(100 * 1024 * 1024, vmem_cap - 16 * 1024 * 1024)
        multi_tc = False
    else:
        # v7x: 64 MiB physical VMEM, 2 TensorCores per chip.
        step_budget = 24 * 1024 * 1024
        vmem_limit = min(56 * 1024 * 1024, vmem_cap - 8 * 1024 * 1024)
        multi_tc = True

    G, Tq = _pick_tiles(
        BH, S, D, in_itemsize, p_itemsize, return_p, step_budget, multi_tc
    )
    scale = 1.0 / math.sqrt(D)
    # TODO(synk): for bf16 inputs, folding the scale into Q rounds Q before the
    # matmul (reference scales the f32 scores); negligible for f32 inputs.

    q_spec = pl.BlockSpec((G, Tq, D), lambda g, i: (g, i, 0))
    kv_spec = pl.BlockSpec((G, S, D), lambda g, i: (g, 0, 0))
    o_spec = pl.BlockSpec((G, Tq, D), lambda g, i: (g, i, 0))

    out_shape = [jax.ShapeDtypeStruct((BH, S, D), query.dtype)]
    out_specs = [o_spec]
    if return_p:
        out_shape.append(jax.ShapeDtypeStruct((BH, S, S), p_out_dtype))
        out_specs.append(pl.BlockSpec((G, Tq, S), lambda g, i: (g, i, 0)))

    # Advisory cost estimate for XLA's scheduler.
    flops = 4 * BH * S * S * D                # QK^T + PV (2 flops / MAC each)
    transcendentals = BH * S * S              # one exp per score
    bytes_accessed = in_itemsize * 3 * BH * S * D + in_itemsize * BH * S * D
    if return_p:
        bytes_accessed += p_itemsize * BH * S * S
    cost = pl.CostEstimate(
        flops=flops, transcendentals=transcendentals, bytes_accessed=bytes_accessed
    )

    results = pl.pallas_call(
        functools.partial(_attn_kernel, scale=scale, mxu_dtype=mxu_dtype),
        out_shape=tuple(out_shape),
        grid_spec=pltpu.PrefetchScalarGridSpec(
            num_scalar_prefetch=0,
            grid=(BH // G, S // Tq),
            in_specs=[q_spec, kv_spec, kv_spec],
            out_specs=tuple(out_specs),
        ),
        compiler_params=pltpu.CompilerParams(
            # BH axis parallel (core-shardable), query-tile axis arbitrary so
            # cross-core sharding never duplicates K/V block DMA.
            dimension_semantics=("parallel", "arbitrary"),
            vmem_limit_bytes=int(vmem_limit),
        ),
        cost_estimate=cost,
    )(qf, kf, vf)

    out = results[0].reshape(B, H, S, D)
    if return_p:
        return out, results[1].reshape(B, H, S, S)
    return out


def _reference(query, key, value):
    d = query.shape[-1]
    scores = jnp.matmul(query, jnp.swapaxes(key, -2, -1)) / math.sqrt(d)
    p = jax.nn.softmax(scores, axis=-1)
    return jnp.matmul(p, value), p


if __name__ == "__main__":
    B, H, S, D = 2, 4, 8, 32
    key0 = jax.random.PRNGKey(0)
    kq, kk, kv = jax.random.split(key0, 3)
    q = jax.random.normal(kq, (B, H, S, D), dtype=jnp.float32)
    k = jax.random.normal(kk, (B, H, S, D), dtype=jnp.float32)
    v = jax.random.normal(kv, (B, H, S, D), dtype=jnp.float32)

    # Full module semantics (context + attention probabilities).
    out, p_attn = attention(q, k, v)
    # Fast path: no p_attn materialization.
    out_fast = attention(q, k, v, return_p=False)
    jax.block_until_ready((out, p_attn, out_fast))

    ref_out, ref_p = _reference(q, k, v)
    assert jnp.allclose(out, ref_out, atol=1e-5, rtol=1e-5), "context mismatch"
    assert jnp.allclose(p_attn, ref_p, atol=1e-5, rtol=1e-5), "p_attn mismatch"
    assert jnp.allclose(out_fast, ref_out, atol=1e-5, rtol=1e-5), "fast-path mismatch"

    print("KERNEL_OK")
</pallas_src>

<mosaic_0001>
module attributes {stable_mosaic.version = 11 : i64} {
  func.func @_attn_kernel(%arg0: i32, %arg1: i32, %arg2: memref<4x8x32xf32, #tpu.memory_space<vmem>>, %arg3: memref<4x8x32xf32, #tpu.memory_space<vmem>>, %arg4: memref<4x8x32xf32, #tpu.memory_space<vmem>>, %arg5: memref<4x8x32xf32, #tpu.memory_space<vmem>>, %arg6: memref<4x8x8xf32, #tpu.memory_space<vmem>>) attributes {dimension_semantics = [#tpu.dimension_semantics<parallel>, #tpu.dimension_semantics<arbitrary>], iteration_bounds = array<i64: 2, 1>, scalar_prefetch = 0 : i64, scratch_operands = 0 : i64, tpu.core_type = #tpu.core_type<tc>, window_params = [{transform_indices = @transform_0, window_bounds = array<i64: 4, 8, 32>}, {transform_indices = @transform_1, window_bounds = array<i64: 4, 8, 32>}, {transform_indices = @transform_2, window_bounds = array<i64: 4, 8, 32>}, {transform_indices = @transform_3, window_bounds = array<i64: 4, 8, 32>}, {transform_indices = @transform_4, window_bounds = array<i64: 4, 8, 8>}]} {
    %c0 = arith.constant 0 : index
    %c0_0 = arith.constant 0 : index
    %c0_1 = arith.constant 0 : index
    %0 = vector.load %arg2[%c0, %c0_0, %c0_1] : memref<4x8x32xf32, #tpu.memory_space<vmem>>, vector<4x8x32xf32>
    %cst = arith.constant 0.176776692 : f32
    %1 = vector.broadcast %cst : f32 to vector<4x8x32xf32>
    %2 = arith.mulf %0, %1 : vector<4x8x32xf32>
    %c0_2 = arith.constant 0 : index
    %c0_3 = arith.constant 0 : index
    %c0_4 = arith.constant 0 : index
    %3 = vector.load %arg3[%c0_2, %c0_3, %c0_4] : memref<4x8x32xf32, #tpu.memory_space<vmem>>, vector<4x8x32xf32>
    %c0_5 = arith.constant 0 : index
    %c0_6 = arith.constant 0 : index
    %c0_7 = arith.constant 0 : index
    %4 = vector.load %arg4[%c0_5, %c0_6, %c0_7] : memref<4x8x32xf32, #tpu.memory_space<vmem>>, vector<4x8x32xf32>
    "tpu.trace_start"() <{level = 10 : i32, message = "gqd,gkd->gqk"}> : () -> ()
    %cst_8 = arith.constant dense<0.000000e+00> : vector<4x8x8xf32>
    %5 = tpu.matmul %2, %3, %cst_8 {dimension_numbers = #tpu.dot_dimension_numbers<[2], [2], [1], [1], [0, 0, 0, 1, 1, 1], [0], [0]>} : vector<4x8x32xf32>, vector<4x8x32xf32>, vector<4x8x8xf32> -> vector<4x8x8xf32>
    "tpu.trace_stop"() : () -> ()
    %cst_9 = arith.constant dense<0xFF800000> : vector<4x8xf32>
    %6 = vector.multi_reduction <maximumf>, %5, %cst_9 [2] : vector<4x8x8xf32> to vector<4x8xf32>
    %7 = vector.shape_cast %6 : vector<4x8xf32> to vector<4x8x1xf32>
    %8 = vector.broadcast %7 : vector<4x8x1xf32> to vector<4x8x8xf32>
    %9 = arith.subf %5, %8 : vector<4x8x8xf32>
    %10 = math.exp %9 : vector<4x8x8xf32>
    %cst_10 = arith.constant dense<0.000000e+00> : vector<4x8xf32>
    %11 = vector.multi_reduction <add>, %10, %cst_10 [2] : vector<4x8x8xf32> to vector<4x8xf32>
    %12 = vector.shape_cast %11 : vector<4x8xf32> to vector<4x8x1xf32>
    %13 = tpu.reciprocal %12 : vector<4x8x1xf32> -> vector<4x8x1xf32>
    %14 = vector.broadcast %13 : vector<4x8x1xf32> to vector<4x8x8xf32>
    %15 = arith.mulf %10, %14 : vector<4x8x8xf32>
    %c0_11 = arith.constant 0 : index
    %c0_12 = arith.constant 0 : index
    %c0_13 = arith.constant 0 : index
    %16 = vector.load %arg6[%c0_11, %c0_12, %c0_13] : memref<4x8x8xf32, #tpu.memory_space<vmem>>, vector<4x8x8xf32>
    tpu.vector_store %arg6[%c0_11, %c0_12, %c0_13], %15 {strides = array<i32>} : memref<4x8x8xf32, #tpu.memory_space<vmem>>, vector<4x8x8xf32>,
    "tpu.trace_start"() <{level = 10 : i32, message = "gqk,gkd->gqd"}> : () -> ()
    %cst_14 = arith.constant dense<0.000000e+00> : vector<4x8x32xf32>
    %17 = tpu.matmul %15, %4, %cst_14 {dimension_numbers = #tpu.dot_dimension_numbers<[2], [1], [1], [2], [0, 0, 0, 1, 1, 2], [0], [0]>} : vector<4x8x8xf32>, vector<4x8x32xf32>, vector<4x8x32xf32> -> vector<4x8x32xf32>
    "tpu.trace_stop"() : () -> ()
    %c0_15 = arith.constant 0 : index
    %c0_16 = arith.constant 0 : index
    %c0_17 = arith.constant 0 : index
    %18 = vector.load %arg5[%c0_15, %c0_16, %c0_17] : memref<4x8x32xf32, #tpu.memory_space<vmem>>, vector<4x8x32xf32>
    tpu.vector_store %arg5[%c0_15, %c0_16, %c0_17], %17 {strides = array<i32>} : memref<4x8x32xf32, #tpu.memory_space<vmem>>, vector<4x8x32xf32>,
    return
  }
  func.func @transform_0(%arg0: i32, %arg1: i32) -> (i32, i32, i32) {
    %c0_i32 = arith.constant 0 : i32
    %c0_i32_0 = arith.constant 0 : i32
    return %arg0, %arg1, %c0_i32 : i32, i32, i32
  }
  func.func @transform_1(%arg0: i32, %arg1: i32) -> (i32, i32, i32) {
    %c0_i32 = arith.constant 0 : i32
    %c0_i32_0 = arith.constant 0 : i32
    %c0_i32_1 = arith.constant 0 : i32
    return %arg0, %c0_i32, %c0_i32_0 : i32, i32, i32
  }
  func.func @transform_2(%arg0: i32, %arg1: i32) -> (i32, i32, i32) {
    %c0_i32 = arith.constant 0 : i32
    %c0_i32_0 = arith.constant 0 : i32
    %c0_i32_1 = arith.constant 0 : i32
    return %arg0, %c0_i32, %c0_i32_0 : i32, i32, i32
  }
  func.func @transform_3(%arg0: i32, %arg1: i32) -> (i32, i32, i32) {
    %c0_i32 = arith.constant 0 : i32
    %c0_i32_0 = arith.constant 0 : i32
    return %arg0, %arg1, %c0_i32 : i32, i32, i32
  }
  func.func @transform_4(%arg0: i32, %arg1: i32) -> (i32, i32, i32) {
    %c0_i32 = arith.constant 0 : i32
    %c0_i32_0 = arith.constant 0 : i32
    return %arg0, %arg1, %c0_i32 : i32, i32, i32
  }
}

</mosaic_0001>

<bundles_post_ra>
// kernel: tpu_custom_call.1
= control target key start
LH: loop header
LB: loop body
LE: loop exit
PB: predicated region body
PF: predicated region fallthrough
CT: control target
= control target key end

     0   :  { %s1940_s0 = inlined_call_operand.hbm [shape: f32[8,8,32], index: 0, kind: input, shape index: {}]   ;;  %s1941_s1 = inlined_call_operand.hbm [shape: f32[8,8,32], index: 1, kind: input, shape index: {}]   ;;  %s1942_s2 = inlined_call_operand.hbm [shape: f32[8,8,32], index: 2, kind: input, shape index: {}]   ;;  %s1943_s3 = inlined_call_operand.hbm [shape: f32[8,8,32], index: 3, kind: output, shape index: {0}]   ;;  %s1944_s4 = inlined_call_operand.hbm [shape: f32[8,8,8], index: 4, kind: output, shape index: {1}]  }
   0x1   :  { %1951 = sst [smem:[#allocation19_spill]] %s1941_s1 }
   0x2   :  { %10 = vsyncpa [#allocation3], 0 }
   0x3   :  { %12 = vsyncpa [#allocation3 + $0x1], 0 }
   0x4   :  { %13 = vsyncpa [#allocation6], 0 }
   0x5   :  { %15 = vsyncpa [#allocation6 + $0x1], 0 }
   0x6   :  { %16 = vsyncpa [#allocation4], 0 }
   0x7   :  { %18 = vsyncpa [#allocation4 + $0x1], 0 }
   0x8   :  { %19 = vsyncpa [#allocation10], 0 }
   0x9   :  { %21 = vsyncpa [#allocation10 + $0x1], 0  ;;  %s1628_s15 = smov 0   ;;  %s1630_s16 = smov 0  }
   0xa   :  { %s1632_s17 = smov 0   ;;  %s1634_s18 = smov 0  }
   0xb   :  { %s1636_s19 = smov 0   ;;  %s1638_s20 = smov 0  }
   0xc LB: > { %1952 = sst [smem:[#allocation15_spill]] %s1586_s19  ;;  %s1659_s21 = sadd.s32 4294967295, %s1590_s20   ;;  %s1590_s20 = sphi %s1638_s20, %s27_s20   ;;  %s1586_s19 = sphi %s1636_s19, %s1969_s19   ;;  %s1582_s18 = sphi %s1634_s18, %s1968_s18   ;;  %s1578_s17 = sphi %s1632_s17, %s1972_s17   ;;  %s1574_s16 = sphi %s1630_s16, %s1971_s16   ;;  %s1570_s15 = sphi %s1628_s15, %s1970_s15  }
   0xd   : > { %s1194_s22 = sadd.s32 4294967294, %s1590_s20   ;;  %s39_s23 = sadd.s32 1, %s1586_s19 }
   0xe   : > { %s48_s24 = sadd.s32 1, %s1578_s17  ;;  %p41_p0 = scmp.ge.s32.totalorder %s39_s23, 2 }
   0xf   : > { %p55_p1 = scmp.ne.s32.totalorder %s1578_s17, %s1574_s16  ;;  %p56_p2 = scmp.eq.s32.totalorder %s1590_s20, 0 }
  0x10   : > { %p61_p3 = scmp.ne.s32.totalorder %s1574_s16, %s1570_s15  ;;  %s1974_s23 = smov (%p41_p0, %s39_s23), 0 }
  0x11   : > { %1953 = sst [smem:[#allocation16_spill]] %s1974_s23  ;;  %p1671_p4 = por %p56_p2, %p55_p1 }
  0x12   : > { %p62_p5 = scmp.eq.s32.totalorder %s1659_s21, 0  ;;  %s43_s26 = ssub.s32 %s1586_s19, %s1974_s23 }
  0x13   : > { %p139_p6 = scmp.eq.s32.totalorder %s1659_s21, 1  ;;  %p46_p7 = scmp.eq.s32.totalorder %s43_s26, 0 }
  0x14   : > { %p1679_p8 = por %p62_p5, %p61_p3  ;;  %p145_p10 = scmp.eq.s32.totalorder %s1194_s22, 1 }
  0x15   : > { %p1683_p9 = por %p139_p6, %p55_p1  ;;  %p1320_p13 = scmp.lt.s32.totalorder %s1590_s20, 2 }
  0x16   : > { %s1688_s29 = scalar_select %p46_p7, %s1578_s17, %s48_s24  }
  0x17   : > { %p1690_p11 = por %p145_p10, %p61_p3  ;;  %s1945_s5 = sand.u32 1, %s1578_s17  }
  0x18   : > { %1957 = sst [smem:[#allocation17_spill]] %s1688_s29  ;;  %s1699_s6 = sshll.u32 %s1945_s5, 5 }
  0x19   : > { %s1958_s30 = scalar_select %p1690_p11, 1, 0 }
  0x1a   : > { %s1702_s7 = sshll.u32 %s1586_s19, 9  ;;  %p1706_p0 = pnand %p1320_p13, %p1671_p4 }
  0x1b   : > { %1959 = sst [smem:[#allocation18_spill]] %s1958_s30  ;;  %s215_s9 = sand.u32 1, %s1590_s20  }
  0x1c   : > { %s1961_s1 = sld [smem:[#allocation19_spill]]  ;;  %s219_s13 = scalar_lea.vmem [#allocation5], %s1699_s6 }
  0x1d   : > { %s226_s14 = sshll.u32 %s219_s13, 4  ;;  %p1206_p1 = scmp.ge.s32.totalorder %s1590_s20, 1  ;;  %s227_s14 = int_to_ptr.vmem [resolvable:$true] %s226_s14 }
  0x1e   : > { %p255_p2 = scmp.lt.s32.totalorder %s1590_s20, 3  ;;  %s1718_s22 = scalar_lea.sflag [#allocation6], %s215_s9 }
  0x1f   : > { %p1394_p3 = pneg %p1706_p0  ;;  %s1405_s24 = scalar_lea.vmem %s227_s14, 512 }
  0x20   : > { %p1406_p4 = scmp.ne.s32.totalorder %s227_s14, %s1405_s24  ;;  %s1592_s25 = smov [#allocation5]  }
  0x21   : > { %s1410_s26 = sshll.u32 %s1592_s25, 4  ;;  %s1411_s26 = int_to_ptr.vmem [resolvable:$false] %s1410_s26 }
  0x22   : > { %s225_s12 = scalar_lea.hbm %s1961_s1, %s1702_s7  ;;  %p1408_p5 = pnand %p1406_p4, %p1394_p3 }
  0x23   : > { %s1412_s10 = scalar_lea.vmem %s1411_s26, 1024  ;;  %p1413_p7 = scmp.lt.s32.totalorder %s227_s14, %s1411_s26 }
  0x24   : > { %p1409_p6 = pneg %p1408_p5  ;;  %p1414_p10 = scmp.lt.s32.totalorder %s1412_s10, %s1405_s24 }
  0x26   : > { %p1415_p13 = por %p1414_p10, %p1413_p7 }
  0x28   : > { %p1416_p12 = pnand %p1415_p13, %p1409_p6 }
  0x2a   : > { %1419 = shalt.err (!%p1416_p12)
}
  0x2b   : > { %s1949_s11 = smov 128   ;;  %s1594_s9 = smov 8  }
  0x2c   : > { %1309 = dma.hbm_to_vmem [thread:$0]  (!%p1706_p0), %s225_s12, 512, %s227_s14, %s1718_s22, %s1949_s11, %s1949_s11, %s1594_s9  }
  0x2d   : > { %p1735_p4 = pnand %p1206_p1, %p255_p2  ;;  %s204_s26 = scalar_lea.hbm %s1940_s0, %s1702_s7 }
  0x2e   : > { %s197_s10 = scalar_lea.vmem [#allocation2], %s1699_s6  ;;  %s246_s19 = scalar_lea.hbm %s1942_s2, %s1702_s7 }
  0x2f   : > { %s205_s5 = sshll.u32 %s197_s10, 4  ;;  %s1963_s29 = sand.u32 1, %s1578_s17   ;;  %s206_s5 = int_to_ptr.vmem [resolvable:$true] %s205_s5 }
  0x30   : > { %s194_s30 = scalar_lea.sflag [#allocation3], %s1963_s29  ;;  %s1433_s12 = scalar_lea.vmem %s206_s5, 512 }
  0x31   : > { %p1434_p12 = scmp.ne.s32.totalorder %s206_s5, %s1433_s12  ;;  %s1595_s14 = smov [#allocation2]  }
  0x32   : > { %s1438_s11 = sshll.u32 %s1595_s14, 4  ;;  %s1439_s11 = int_to_ptr.vmem [resolvable:$false] %s1438_s11 }
  0x33   : > { %p1436_p1 = pnand %p1434_p12, %p1394_p3  ;;  %s1440_s24 = scalar_lea.vmem %s1439_s11, 1024 }
  0x34   : > { %p1441_p5 = scmp.lt.s32.totalorder %s206_s5, %s1439_s11  ;;  %p1442_p6 = scmp.lt.s32.totalorder %s1440_s24, %s1433_s12 }
  0x35   : > { %p1437_p2 = pneg %p1436_p1 }
  0x36   : > { %p1443_p7 = por %p1442_p6, %p1441_p5 }
  0x38   : > { %p1444_p10 = pnand %p1443_p7, %p1437_p2 }
  0x3a   : > { %1447 = shalt.err (!%p1444_p10)
}
  0x3b   : > { %s1964_s1 = smov 128   ;;  %s240_s23 = scalar_lea.vmem [#allocation7], %s1699_s6 }
  0x3c   : > { %1306 = dma.hbm_to_vmem [thread:$0]  (!%p1706_p0), %s204_s26, 512, %s206_s5, %s194_s30, %s1964_s1, %s1964_s1, %s1594_s9  }
  0x3d   : > { %s247_s29 = sshll.u32 %s240_s23, 4  ;;  %s1596_s11 = smov [#allocation7]   ;;  %s248_s29 = int_to_ptr.vmem [resolvable:$true] %s247_s29 }
  0x3e   : > { %s1461_s25 = scalar_lea.vmem %s248_s29, 512  ;;  %s1466_s10 = sshll.u32 %s1596_s11, 4  ;;  %s1467_s10 = int_to_ptr.vmem [resolvable:$false] %s1466_s10 }
  0x3f   : > { %p1462_p13 = scmp.ne.s32.totalorder %s248_s29, %s1461_s25  ;;  %s1468_s12 = scalar_lea.vmem %s1467_s10, 1024 }
  0x40   : > { %p1469_p2 = scmp.lt.s32.totalorder %s248_s29, %s1467_s10  ;;  %p1470_p5 = scmp.lt.s32.totalorder %s1468_s12, %s1461_s25 }
  0x41   : > { %p1464_p12 = pnand %p1462_p13, %p1394_p3 }
  0x42   : > { %p1471_p6 = por %p1470_p5, %p1469_p2 }
  0x43   : > { %p1465_p1 = pneg %p1464_p12 }
  0x45   : > { %p1472_p7 = pnand %p1471_p6, %p1465_p1 }
  0x47   : > { %1475 = shalt.err (!%p1472_p7)
}
  0x48   : > { %1312 = dma.hbm_to_vmem [thread:$0]  (!%p1706_p0), %s246_s19, 512, %s248_s29, %s1718_s22, %s1964_s1, %s1964_s1, %s1594_s9  }
  0x49   : > { %259 = sbr.rel (%p1735_p4) target bundleno = 808 (0x328), region = 32  ;;  %s1776_s6 = sand.u32 (!%p1735_p4), 1, %s1574_s16  }
  0x4a   : > { %s1779_s8 = sshll.u32 (!%p1735_p4), %s1776_s6, 5  ;;  %s262_s26 = scalar_lea.sflag (!%p1735_p4), [#allocation3], %s1776_s6 }
  0x4b   : > { %s265_s14 = scalar_lea.vmem (!%p1735_p4), [#allocation2], %s1779_s8 }
  0x4e   : > { %1553 = dma.done.wait (%p1679_p8), %s262_s26, 512  }
  0x4f   : > { %1555 = vsyncadd (%p1679_p8), %s262_s26, 4294966784  ;;  %s270_s19 = sand.u32 1, %s1659_s21   ;;  %s274_s22 = scalar_lea.vmem [#allocation5], %s1779_s8 }
  0x50   : > { %s271_s7 = scalar_lea.sflag [#allocation6], %s270_s19 }
  0x51   : > { %1557 = dma.done.wait (%p1679_p8), %s271_s7, 1024  }
  0x52   : > { %1559 = vsyncadd (%p1679_p8), %s271_s7, 4294966272  ;;  %v1597_v0 = vmov 0.0   ;;  %vm1598_vm0 = vmmov 0   ;;  %vm344_vm1 = vcmask 261120   ;;  %v336_v1 = vld [vmem:[%s274_s22] sm:$0xff]  ;;  %v337_v3 = vld [vmem:[%s274_s22 + $0x8] sm:$0xff] }
  0x53   : > { %1253 = vmatprep.subr.mxu0 %v1597_v0  ;;  %1255 = vmatprep.mubr.msk.f32.mxu0 %vm1598_vm0, %v1597_v0  ;;  %v328_v2 = vld [vmem:[%s265_s14] sm:$0xff]  ;;  %v329_v5 = vld [vmem:[%s265_s14 + $0x8] sm:$0xff]  ;;  %v330_v6 = vld [vmem:[%s265_s14 + $0x10] sm:$0xff]  ;;  %vm649_vm2 = vcmask 64512   ;;  %s283_s21 = scalar_lea.vmem [#allocation7], %s1779_s8  ;;  %s322_s27 = scalar_lea.vmem [#allocation9], %s1779_s8 }
  0x54   : > { %1258 = vmatprep.subr.mxu1 %v1597_v0  ;;  %1260 = vmatprep.mubr.msk.f32.mxu1 %vm1598_vm0, %v1597_v0  ;;  %v332_v4 = vmul.f32 0.17677669, %v328_v2  ;;  %v338_v7 = vld [vmem:[%s274_s22 + $0x10] sm:$0xff]  ;;  %v333_v8 = vmul.f32 0.17677669, %v329_v5  ;;  %v331_v9 = vld [vmem:[%s265_s14 + $0x18] sm:$0xff] }
  0x55   : > { %1254 = vmatpush3.xpose.msk.msra.mxu0 %vm344_vm1, %v336_v1  ;;  %1259 = vmatpush3.xpose.msk.msra.mxu1 %vm344_vm1, %v337_v3  ;;  %v339_v10 = vld [vmem:[%s274_s22 + $0x18] sm:$0xff]  ;;  %v334_v11 = vmul.f32 0.17677669, %v330_v6  ;;  %v335_v12 = vmul.f32 0.17677669, %v331_v9  ;;  %v340_v45 = vld [vmem:[%s283_s21] sm:$0xff] }
  0x56   : > { %1263 = vmatprep.subr.mxu0 %v1597_v0  ;;  %1268 = vmatprep.subr.mxu1 %v1597_v0  ;;  %v341_v46 = vld [vmem:[%s283_s21 + $0x8] sm:$0xff]  ;;  %v342_v53 = vld [vmem:[%s283_s21 + $0x10] sm:$0xff]  ;;  %v343_v57 = vld [vmem:[%s283_s21 + $0x18] sm:$0xff]  ;;  %s1235_s9 = sshll.u32 %s1582_s18, 9  ;;  %s1031_s13 = sshll.u32 %s322_s27, 4  ;;  %s1851_s13 = int_to_ptr.vmem [resolvable:$true] %s1031_s13 }
  0x57   : > { %s1849_s23 = scalar_lea.hbm %s1944_s4, %s1235_s9  ;;  %s1000_s29 = scalar_lea.sflag [#allocation10], %s1776_s6 }
  0x58   : > { %1256 = vmatmul.mubr.msk.f32.vlgmr.msra.gmra.mxu0 %vm344_vm1, %v332_v4  ;;  %1261 = vmatmul.mubr.msk.f32.vlgmr.msra.gmra.mxu1 %vm344_vm1, %v333_v8  ;;  %s1476_s25 = scalar_lea.vmem %s1851_s13, 512  ;;  %s1599_s11 = smov [#allocation9]  }
  0x59   : > { %1264 = vmatpush3.xpose.msk.msra.mxu0 %vm344_vm1, %v338_v7  ;;  %1265 = vmatprep.mubr.msk.f32.mxu0 %vm1598_vm0, %v1597_v0  ;;  %p1477_p8 = scmp.ne.s32.totalorder %s1851_s13, %s1476_s25  ;;  %s1480_s10 = sshll.u32 %s1599_s11, 4  ;;  %s1481_s10 = int_to_ptr.vmem [resolvable:$false] %s1480_s10 }
  0x5a   : > { %1269 = vmatpush3.xpose.msk.msra.mxu1 %vm344_vm1, %v339_v10  ;;  %1270 = vmatprep.mubr.msk.f32.mxu1 %vm1598_vm0, %v1597_v0  ;;  %s1482_s12 = scalar_lea.vmem %s1481_s10, 1024  ;;  %p1483_p4 = scmp.lt.s32.totalorder %s1851_s13, %s1481_s10 }
  0x5b   : > { %1273 = vmatprep.subr.mxu0 %v1597_v0  ;;  %1278 = vmatprep.subr.mxu1 %v1597_v0  ;;  %p1478_p0 = pnand %p1477_p8, %p1683_p9  ;;  %p1484_p10 = scmp.lt.s32.totalorder %s1482_s12, %s1476_s25 }
  0x5c   : > { %1266 = vmatmul.mubr.msk.f32.vlgmr.msra.gmra.mxu0 %vm344_vm1, %v334_v11 }
  0x5d   : > { %1271 = vmatmul.mubr.msk.f32.vlgmr.msra.gmra.mxu1 %vm344_vm1, %v335_v12  ;;  %1275 = vmatprep.mubr.msk.f32.mxu0 %vm1598_vm0, %v1597_v0  ;;  %p1479_p3 = pneg %p1478_p0  ;;  %p1485_p13 = por %p1484_p10, %p1483_p4 }
  0x5e   : > { %1280 = vmatprep.mubr.msk.f32.mxu1 %vm1598_vm0, %v1597_v0  ;;  %1274 = vmatpush3.msra.mxu0 %v340_v45 }
  0x5f   : > { %1283 = vmatprep.subr.mxu0 %v1597_v0  ;;  %1279 = vmatpush3.msra.mxu1 %v341_v46  ;;  %p1486_p12 = pnand %p1485_p13, %p1479_p3 }
  0x60   : > { %1288 = vmatprep.subr.mxu1 %v1597_v0 }
 0x118   : > { %v417_v13 = vpop.f32.mrf.mxu0  ;;  %v493_v14 = vpop.f32.mrf.mxu1 }
 0x119   : > { %v650_v15 = vsel %vm649_vm2, %v417_v13, -inf  ;;  %v653_v18 = vsel %vm649_vm2, %v493_v14, -inf }
 0x11a   : > { %651 = vmax.xlane.f32.xlu0 %v650_v15  ;;  %v1257_v16 = vpop.f32.mrf.mxu0  ;;  %v1262_v17 = vpop.f32.mrf.mxu1 }
 0x11c   : > { %v569_v19 = vpop.f32.mrf.mxu0 }
 0x11d   : > { %v656_v20 = vsel %vm649_vm2, %v569_v19, -inf  ;;  %v645_v21 = vpop.f32.mrf.mxu1 }
 0x11e   : > { %654 = vmax.xlane.f32.xlu0 %v653_v18  ;;  %657 = vmax.xlane.f32.xlu1 %v656_v20  ;;  %v1267_v22 = vpop.f32.mrf.mxu0  ;;  %v659_v24 = vsel %vm649_vm2, %v645_v21, -inf }
 0x11f   : > { %v1272_v23 = vpop.f32.mrf.mxu1 }
 0x122   : > { %660 = vmax.xlane.f32.xlu1 %v659_v24 }
 0x1a3   : > { %v652_v25 = vpop.xlane.xlu0 %651 }
 0x1a4   : > { %v662_v26 = vsub.f32 %v417_v13, %v652_v25 }
 0x1a6   : > { %v666_v27 = vmul.f32 1.442695, %v662_v26 }
 0x1a7   : > { %v655_v28 = vpop.xlane.xlu0 %654  ;;  %v658_v29 = vpop.xlane.xlu1 %657 }
 0x1a8   : > { %1376 = vpow2.f32 %v666_v27  ;;  %v663_v30 = vsub.f32 %v493_v14, %v655_v28  ;;  %v664_v31 = vsub.f32 %v569_v19, %v658_v29 }
 0x1aa   : > { %v668_v32 = vmul.f32 1.442695, %v663_v30  ;;  %v670_v33 = vmul.f32 1.442695, %v664_v31 }
 0x1ab   : > { %v661_v34 = vpop.xlane.xlu1 %660 }
 0x1ac   : > { %1378 = vpow2.f32 %v668_v32  ;;  %v665_v35 = vsub.f32 %v645_v21, %v661_v34 }
 0x1ad   : > { %1380 = vpow2.f32 %v670_v33 }
 0x1ae   : > { %v672_v36 = vmul.f32 1.442695, %v665_v35 }
 0x1b0   : > { %1382 = vpow2.f32 %v672_v36 }
 0x1b5   : > { %v1377_v37 = vpop.eup %1376 }
 0x1b6   : > { %v674_v38 = vsel %vm649_vm2, %v1377_v37, 0.0 }
 0x1b7   : > { %675 = vadd.xlane.f32.xlu0 %v674_v38 }
 0x1b9   : > { %v1379_v39 = vpop.eup %1378 }
 0x1ba   : > { %v1381_v40 = vpop.eup %1380  ;;  %v677_v41 = vsel %vm649_vm2, %v1379_v39, 0.0 }
 0x1bb   : > { %678 = vadd.xlane.f32.xlu1 %v677_v41  ;;  %v680_v42 = vsel %vm649_vm2, %v1381_v40, 0.0 }
 0x1bc   : > { %681 = vadd.xlane.f32.xlu0 %v680_v42 }
 0x1bd   : > { %v1383_v43 = vpop.eup %1382 }
 0x1be   : > { %v683_v44 = vsel %vm649_vm2, %v1383_v43, 0.0 }
 0x1bf   : > { %684 = vadd.xlane.f32.xlu1 %v683_v44 }
 0x240   : > { %v676_v47 = vpop.xlane.xlu0 %675 }
 0x241   : > { %1384 = vrcp.f32 %v676_v47 }
 0x244   : > { %v679_v48 = vpop.xlane.xlu1 %678 }
 0x245   : > { %v682_v49 = vpop.xlane.xlu0 %681  ;;  %1386 = vrcp.f32 %v679_v48 }
 0x246   : > { %1388 = vrcp.f32 %v682_v49 }
 0x248   : > { %v685_v50 = vpop.xlane.xlu1 %684 }
 0x249   : > { %1390 = vrcp.f32 %v685_v50 }
 0x24e   : > { %v1385_v51 = vpop.eup %1384 }
 0x24f   : > { %v690_v52 = vmul.f32 %v1385_v51, %v1377_v37 }
 0x251   : > { %694 = vst.msk [vmem:[%s322_s27] sm:$0xff] %vm649_vm2, %v690_v52  ;;  %1276 = vmatmul.mubr.msk.f32.vlgmr.msra.gmra.mxu0 %vm649_vm2, %v690_v52 }
 0x252   : > { %v1387_v54 = vpop.eup %1386  ;;  %1284 = vmatpush3.msra.mxu0 %v342_v53  ;;  %1285 = vmatprep.mubr.msk.f32.mxu0 %vm1598_vm0, %v1597_v0 }
 0x253   : > { %v1389_v55 = vpop.eup %1388  ;;  %v691_v56 = vmul.f32 %v1387_v54, %v1379_v39 }
 0x254   : > { %v692_v58 = vmul.f32 %v1389_v55, %v1381_v40 }
 0x255   : > { %695 = vst.msk [vmem:[%s322_s27 + $0x8] sm:$0xff] %vm649_vm2, %v691_v56  ;;  %1281 = vmatmul.mubr.msk.f32.vlgmr.msra.gmra.mxu1 %vm649_vm2, %v691_v56 }
 0x256   : > { %v1391_v59 = vpop.eup %1390  ;;  %696 = vst.msk [vmem:[%s322_s27 + $0x10] sm:$0xff] %vm649_vm2, %v692_v58  ;;  %1286 = vmatmul.mubr.msk.f32.vlgmr.msra.gmra.mxu0 %vm649_vm2, %v692_v58  ;;  %1289 = vmatpush3.msra.mxu1 %v343_v57 }
 0x257   : > { %1290 = vmatprep.mubr.msk.f32.mxu1 %vm1598_vm0, %v1597_v0  ;;  %v693_v60 = vmul.f32 %v1391_v59, %v1383_v43 }
 0x259   : > { %697 = vst.msk [vmem:[%s322_s27 + $0x18] sm:$0xff] %vm649_vm2, %v693_v60  ;;  %1291 = vmatmul.mubr.msk.f32.vlgmr.msra.gmra.mxu1 %vm649_vm2, %v693_v60 }
 0x25a   : > { %1489 = shalt.err (!%p1486_p12)
}
 0x25b   : > { %s1490_s30 = scalar_lea.hbm %s1849_s23, 512  ;;  %s1494_s14 = scalar_lea.hbm %s1944_s4, 1024 }
 0x25c   : > { %p1491_p1 = scmp.ne.s32.totalorder %s1849_s23, %s1490_s30  ;;  %p1495_p6 = scmp.lt.s32.totalorder %s1849_s23, %s1944_s4 }
 0x25d   : > { %p1496_p7 = scmp.lt.s32.totalorder %s1494_s14, %s1490_s30 }
 0x25e   : > { %p1492_p2 = pnand %p1491_p1, %p1683_p9 }
 0x25f   : > { %p1497_p8 = por %p1496_p7, %p1495_p6 }
 0x260   : > { %p1493_p5 = pneg %p1492_p2 }
 0x262   : > { %p1498_p0 = pnand %p1497_p8, %p1493_p5 }
 0x264   : > { %1501 = shalt.err (!%p1498_p0)
}
 0x265   : > { %s1600_s22 = smov 128   ;;  %s1601_s21 = smov 8  }
 0x266   : > { %1300 = dma.vmem_to_hbm [thread:$0]  (%p1683_p9), %s1851_s13, 512, %s1849_s23, %s1000_s29, %s1600_s22, %s1600_s22, %s1601_s21  }
 0x267   : > { %s315_s27 = scalar_lea.vmem [#allocation8], %s1779_s8  ;;  %s1890_s1 = scalar_lea.hbm %s1943_s3, %s1235_s9 }
 0x268   : > { %s1014_s24 = sshll.u32 %s315_s27, 4  ;;  %s995_s23 = scalar_lea.sflag [#allocation4], %s1776_s6  ;;  %s1882_s24 = int_to_ptr.vmem [resolvable:$true] %s1014_s24 }
 0x269   : > { %s1502_s29 = scalar_lea.vmem %s1882_s24, 512  ;;  %s1602_s25 = smov [#allocation8]  }
 0x26a   : > { %p1503_p3 = scmp.ne.s32.totalorder %s1882_s24, %s1502_s29  ;;  %s1506_s11 = sshll.u32 %s1602_s25, 4  ;;  %s1507_s11 = int_to_ptr.vmem [resolvable:$false] %s1506_s11 }
 0x26b   : > { %s1508_s10 = scalar_lea.vmem %s1507_s11, 1024  ;;  %p1509_p13 = scmp.lt.s32.totalorder %s1882_s24, %s1507_s11 }
 0x26c   : > { %p1504_p4 = pnand %p1503_p3, %p1683_p9  ;;  %p1510_p12 = scmp.lt.s32.totalorder %s1508_s10, %s1502_s29 }
 0x26e   : > { %p1505_p10 = pneg %p1504_p4  ;;  %p1511_p1 = por %p1510_p12, %p1509_p13 }
 0x270   : > { %p1512_p2 = pnand %p1511_p1, %p1505_p10 }
 0x311   : > { %v767_v61 = vpop.f32.mrf.mxu0 }
 0x312   : > { %990 = vst.msk [vmem:[%s315_s27] sm:$0xff] %vm344_vm1, %v767_v61 }
 0x313   : > { %v1277_v62 = vpop.f32.mrf.mxu0 }
 0x315   : > { %v840_v63 = vpop.f32.mrf.mxu1 }
 0x316   : > { %991 = vst.msk [vmem:[%s315_s27 + $0x8] sm:$0xff] %vm344_vm1, %v840_v63  ;;  %v913_v0 = vpop.f32.mrf.mxu0 }
 0x317   : > { %992 = vst.msk [vmem:[%s315_s27 + $0x10] sm:$0xff] %vm344_vm1, %v913_v0  ;;  %v1282_v1 = vpop.f32.mrf.mxu1 }
 0x318   : > { %v1287_v2 = vpop.f32.mrf.mxu0 }
 0x319   : > { %v986_v3 = vpop.f32.mrf.mxu1 }
 0x31a   : > { %993 = vst.msk [vmem:[%s315_s27 + $0x18] sm:$0xff] %vm344_vm1, %v986_v3 }
 0x31b   : > { %v1292_v4 = vpop.f32.mrf.mxu1 }
 0x31c   : > { %1515 = shalt.err (!%p1512_p2)
}
 0x31d   : > { %s1516_s18 = scalar_lea.hbm %s1890_s1, 512  ;;  %s1520_s12 = scalar_lea.hbm %s1943_s3, 1024 }
 0x31e   : > { %p1517_p5 = scmp.ne.s32.totalorder %s1890_s1, %s1516_s18  ;;  %p1521_p8 = scmp.lt.s32.totalorder %s1890_s1, %s1943_s3 }
 0x31f   : > { %p1522_p0 = scmp.lt.s32.totalorder %s1520_s12, %s1516_s18 }
 0x320   : > { %p1518_p6 = pnand %p1517_p5, %p1683_p9 }
 0x321   : > { %p1523_p3 = por %p1522_p0, %p1521_p8 }
 0x322   : > { %p1519_p7 = pneg %p1518_p6 }
 0x324   : > { %p1524_p4 = pnand %p1523_p3, %p1519_p7 }
 0x326   : > { %1527 = shalt.err (!%p1524_p4)
}
 0x327   : > { %1299 = dma.vmem_to_hbm [thread:$0]  (%p1683_p9), %s1882_s24, 512, %s1890_s1, %s995_s23, %s1600_s22, %s1600_s22, %s1601_s21  }
 0x328 PF: > { %s1046_s14 = sand.u32 1, %s1570_s15   ;;  %p1966_p10 = scmp.ge.s32.totalorder %s1590_s20, 2 }
 0x329   : > { %s1047_s19 = scalar_lea.sflag [#allocation4], %s1046_s14 }
 0x32a   : > { %p1314_p13 = pnand %p1966_p10, %p1690_p11 }
 0x32c   : > { %p1315_p12 = pneg %p1314_p13 }
 0x32e   : > { %1561 = dma.done.wait (%p1315_p12), %s1047_s19, 512  }
 0x32f   : > { %1563 = vsyncadd (%p1315_p12), %s1047_s19, 4294966784  ;;  %s1056_s7 = scalar_lea.sflag [#allocation10], %s1046_s14 }
 0x330   : > { %1565 = dma.done.wait (%p1315_p12), %s1056_s7, 512  }
 0x331   : > { %1567 = vsyncadd (%p1315_p12), %s1056_s7, 4294966784  ;;  %s27_s20 = sadd.s32 1, %s1590_s20   ;;  %s1967_s28 = sld [smem:[#allocation17_spill]] }
 0x332   : > { %p24_p1 = scmp.ge.s32.totalorder %s27_s20, 4   ;;  %s1968_s18 = sld [smem:[#allocation15_spill]] }
 0x333   : > { %s1969_s19 = sld [smem:[#allocation16_spill]]  ;;  %s1970_s15 = smov %s1574_s16 }
 0x334   : > { %s1971_s16 = smov %s1578_s17  ;;  %26 = sbr.rel (!%p24_p1) target bundleno = 12 (0xc), region = 118 }
 0x337   : > { %s1972_s17 = smov %s1967_s28 }
 0x339   :  { %1061 = vsyncpa [#allocation3], 1 }
 0x33a   :  { %1063 = vsyncpa [#allocation3 + $0x1], 1 }
 0x33b   :  { %1064 = vsyncpa [#allocation6], 1 }
 0x33c   :  { %1066 = vsyncpa [#allocation6 + $0x1], 1 }
 0x33d   :  { %1067 = vsyncpa [#allocation4], 1 }
 0x33e   :  { %1069 = vsyncpa [#allocation4 + $0x1], 1 }
 0x33f   :  { %1070 = vsyncpa [#allocation10], 1 }
 0x340   :  { %1072 = vsyncpa [#allocation10 + $0x1], 1 }

</bundles_post_ra>
